<compile_context>
chip_gen: v5e
topology: v5e:2x2
jax: 0.10.0
libtpu: 0.0.40
codegen_flags: <defaults>
</compile_context>

<pallas_src>
import functools

import jax
import jax.numpy as jnp
from jax import lax
from jax.experimental import pallas as pl
from jax.experimental.pallas import tpu as pltpu

# ----------------------------- problem sizes --------------------------------
BATCH = 2
SEQ = 8
HIDDEN = 32
NUM_HEADS = 4
HEAD_DIM = HIDDEN // NUM_HEADS
ALL_HEAD = NUM_HEADS * HEAD_DIM  # == HIDDEN here


# ------------------------------- kernel -------------------------------------
def _bert_attention_kernel(x_ref, bias_ref, wqkv_ref, bqkv_ref, wo_ref, bo_ref,
                           out_ref, *, rows, num_heads, head_dim):
    """One grid step processes the whole (tiny) batch.

    x_ref:    (R, H)    flattened batch*seq hidden rows, R = B*S
    bias_ref: (R, R)    additive score bias: key mask + cross-batch block mask
    wqkv_ref: (H, 3*A)  fused [Wq|Wk|Wv], already (in, out)
    bqkv_ref: (1, 3*A)  fused [bq|bk|bv]
    wo_ref:   (A, H)    output projection weight, (in, out)
    bo_ref:   (1, H)    output projection bias
    out_ref:  (R, H)
    """
    a = num_heads * head_dim

    x = x_ref[...]                        # (R, H)
    bias = bias_ref[...]                  # (R, R)
    wo = wo_ref[...]                      # (A, H)

    # Fused QKV projection: one MXU pass with N = 3*A instead of three N = A passes.
    qkv = jnp.dot(x, wqkv_ref[...],
                  preferred_element_type=jnp.float32) + bqkv_ref[...]   # (R, 3A)

    # Scores for all heads over the whole batch, contracting the head dim of q and k
    # directly (K-transpose folded into the MXU operand fetch; no explicit (R,D)
    # transposes through the XLU).  Cross-batch attention and masked keys are killed
    # by the additive bias.  NOTE: no 1/sqrt(D) scaling — matches the reference module.
    dn = (((1,), (1,)), ((), ()))
    s_parts = []
    for h in range(num_heads):            # static unroll, NUM_HEADS = 4
        q_h = qkv[:, h * head_dim:(h + 1) * head_dim]            # (R, D)
        k_h = qkv[:, a + h * head_dim: a + (h + 1) * head_dim]   # (R, D)
        s_h = lax.dot_general(q_h, k_h, dn,
                              preferred_element_type=jnp.float32)  # (R, R)
        s_parts.append(s_h + bias)
    s = jnp.concatenate(s_parts, axis=0)  # (NH*R, R), cheap sublane concat

    # One batched softmax over keys for all heads / batch elements.
    # Exact divide: the approximate EUP reciprocal is not worth its error budget at
    # this size and was part of the previous correctness failure.
    m = jnp.max(s, axis=-1, keepdims=True)
    e = jnp.exp(s - m)
    p = e / jnp.sum(e, axis=-1, keepdims=True)                    # (NH*R, R)

    # Context + output dense projection; head merge folded into the projection as a
    # sum over per-head (D, H) weight slabs -> no lane-axis concat.
    acc = None
    for h in range(num_heads):
        p_h = p[h * rows:(h + 1) * rows, :]                                 # (R, R)
        v_h = qkv[:, 2 * a + h * head_dim: 2 * a + (h + 1) * head_dim]      # (R, D)
        ctx_h = jnp.dot(p_h, v_h, preferred_element_type=jnp.float32)       # (R, D)
        term = jnp.dot(ctx_h, wo[h * head_dim:(h + 1) * head_dim, :],
                       preferred_element_type=jnp.float32)                  # (R, H)
        acc = term if acc is None else acc + term

    # Single full-block store (no masked sub-stores).
    out_ref[...] = (acc + bo_ref[...]).astype(out_ref.dtype)


# --------------------------- one-time param prep ------------------------------
def fuse_bert_attention_params(params):
    """One-time parameter preprocessing (hoisted out of the forward call).

    PyTorch Linear weights are (out, in); transpose to (in, out) and fuse Q/K/V."""
    a = params["wq"].shape[0]
    h = params["wq"].shape[1]
    wqkv = jnp.concatenate(
        [params["wq"].T, params["wk"].T, params["wv"].T], axis=1)          # (H, 3A)
    bqkv = jnp.concatenate(
        [params["bq"], params["bk"], params["bv"]]).reshape(1, 3 * a)      # (1, 3A)
    return {
        "wqkv": wqkv,
        "bqkv": bqkv,
        "wo": params["wo"].T,                                              # (A, H)
        "bo": params["bo"].reshape(1, h),                                  # (1, H)
    }


# ------------------------------- forward --------------------------------------
@jax.jit
def bert_attention(hidden_states, attention_mask, fused):
    """hidden_states: (B, S, H) f32, attention_mask: (B, S) f32 of 0/1,
    fused: output of fuse_bert_attention_params (computed once)."""
    B, S, H = hidden_states.shape
    R = B * S
    A = fused["wo"].shape[0]

    # Additive score bias (R, R): 0 where the query may attend, float32 min where the
    # key is masked OR the query/key belong to different batch elements (this is what
    # lets the whole batch share one score matmul per head inside the kernel).
    min_val = jnp.finfo(jnp.float32).min
    key_bias = jnp.where(attention_mask.astype(bool), 0.0, min_val)
    key_bias = key_bias.astype(jnp.float32).reshape(R)                     # (R,)
    row_b = lax.broadcasted_iota(jnp.int32, (R, R), 0) // S
    col_b = lax.broadcasted_iota(jnp.int32, (R, R), 1) // S
    bias = jnp.where(row_b == col_b, key_bias[None, :], min_val)           # (R, R)

    x_flat = hidden_states.reshape(R, H).astype(jnp.float32)

    kernel = functools.partial(_bert_attention_kernel, rows=R,
                               num_heads=NUM_HEADS, head_dim=HEAD_DIM)

    # Whole problem (~20-30 KB resident) runs in ONE grid step on one TensorCore:
    # no per-step pipeline overhead, weights DMA'd once.  VMEM/tiling deliberately
    # left untuned — residency is negligible on v5e/v6e/v7x alike.
    grid_spec = pltpu.PrefetchScalarGridSpec(
        num_scalar_prefetch=0,
        grid=(1,),
        in_specs=[
            pl.BlockSpec((R, H), lambda i: (0, 0)),          # hidden-state rows
            pl.BlockSpec((R, R), lambda i: (0, 0)),          # additive score bias
            pl.BlockSpec((H, 3 * A), lambda i: (0, 0)),      # fused Wqkv
            pl.BlockSpec((1, 3 * A), lambda i: (0, 0)),      # fused bqkv
            pl.BlockSpec((A, H), lambda i: (0, 0)),          # Wo
            pl.BlockSpec((1, H), lambda i: (0, 0)),          # bo
        ],
        out_specs=pl.BlockSpec((R, H), lambda i: (0, 0)),
    )

    out_flat = pl.pallas_call(
        kernel,
        out_shape=jax.ShapeDtypeStruct((R, H), jnp.float32),
        grid_spec=grid_spec,
        compiler_params=pltpu.CompilerParams(
            dimension_semantics=("arbitrary",)),
    )(x_flat, bias, fused["wqkv"], fused["bqkv"], fused["wo"], fused["bo"])

    return out_flat.reshape(B, S, H)


# ---------------------------- pure-JAX reference -----------------------------
def bert_attention_ref(x, mask, params):
    B, S, H = x.shape
    min_val = jnp.finfo(jnp.float32).min
    hp = lax.Precision.HIGHEST  # keep the reference f32-exact (TPU default is bf16)

    def linear(t, w, b):
        return jnp.einsum("...i,oi->...o", t, w, precision=hp) + b

    q = linear(x, params["wq"], params["bq"]).reshape(B, S, NUM_HEADS, HEAD_DIM)
    k = linear(x, params["wk"], params["bk"]).reshape(B, S, NUM_HEADS, HEAD_DIM)
    v = linear(x, params["wv"], params["bv"]).reshape(B, S, NUM_HEADS, HEAD_DIM)
    q = q.transpose(0, 2, 1, 3)
    k = k.transpose(0, 2, 1, 3)
    v = v.transpose(0, 2, 1, 3)
    scores = jnp.einsum("bhqd,bhkd->bhqk", q, k, precision=hp)   # no 1/sqrt(d): matches module
    bias = jnp.where(mask.astype(bool), 0.0, min_val)[:, None, None, :]
    probs = jax.nn.softmax(scores + bias, axis=-1)
    ctx = jnp.einsum("bhqk,bhkd->bhqd", probs, v, precision=hp)
    ctx = ctx.transpose(0, 2, 1, 3).reshape(B, S, ALL_HEAD)
    return linear(ctx, params["wo"], params["bo"])


# --------------------------------- main ---------------------------------------
if __name__ == "__main__":
    key = jax.random.PRNGKey(0)
    keys = jax.random.split(key, 10)

    scale = 1.0 / jnp.sqrt(HIDDEN)
    params = {
        "wq": jax.random.normal(keys[0], (ALL_HEAD, HIDDEN), jnp.float32) * scale,
        "bq": jax.random.normal(keys[1], (ALL_HEAD,), jnp.float32) * 0.01,
        "wk": jax.random.normal(keys[2], (ALL_HEAD, HIDDEN), jnp.float32) * scale,
        "bk": jax.random.normal(keys[3], (ALL_HEAD,), jnp.float32) * 0.01,
        "wv": jax.random.normal(keys[4], (ALL_HEAD, HIDDEN), jnp.float32) * scale,
        "bv": jax.random.normal(keys[5], (ALL_HEAD,), jnp.float32) * 0.01,
        "wo": jax.random.normal(keys[6], (HIDDEN, ALL_HEAD), jnp.float32) * scale,
        "bo": jax.random.normal(keys[7], (HIDDEN,), jnp.float32) * 0.01,
    }

    x = jax.random.normal(keys[8], (BATCH, SEQ, HIDDEN), jnp.float32)
    # mask out the last two key positions of batch element 1
    attention_mask = jnp.ones((BATCH, SEQ), jnp.float32).at[1, -2:].set(0.0)

    # One-time weight fusion (hoisted out of the forward call).
    fused = jax.tree_util.tree_map(jax.block_until_ready,
                                   fuse_bert_attention_params(params))

    out = bert_attention(x, attention_mask, fused)
    out = jax.block_until_ready(out)

    ref = bert_attention_ref(x, attention_mask, params)
    assert out.shape == (BATCH, SEQ, HIDDEN)
    # Both sides are f32-exact now (no approx reciprocal, HIGHEST-precision reference);
    # expected error ~1e-5, tolerance kept loose for MXU accumulation-order differences.
    assert jnp.allclose(out, ref, atol=2e-3, rtol=2e-3), "mismatch vs reference"

    print("KERNEL_OK")
</pallas_src>

<mosaic_0001>
module attributes {stable_mosaic.version = 11 : i64} {
  func.func @_bert_attention_kernel(%arg0: i32, %arg1: memref<16x32xf32, #tpu.memory_space<vmem>>, %arg2: memref<16x16xf32, #tpu.memory_space<vmem>>, %arg3: memref<32x96xf32, #tpu.memory_space<vmem>>, %arg4: memref<1x96xf32, #tpu.memory_space<vmem>>, %arg5: memref<32x32xf32, #tpu.memory_space<vmem>>, %arg6: memref<1x32xf32, #tpu.memory_space<vmem>>, %arg7: memref<16x32xf32, #tpu.memory_space<vmem>>) attributes {dimension_semantics = [#tpu.dimension_semantics<arbitrary>], iteration_bounds = array<i64: 1>, scalar_prefetch = 0 : i64, scratch_operands = 0 : i64, tpu.core_type = #tpu.core_type<tc>, window_params = [{pipeline_mode = #tpu.pipeline_mode<synchronous>, transform_indices = @transform_0, window_bounds = array<i64: 16, 32>}, {pipeline_mode = #tpu.pipeline_mode<synchronous>, transform_indices = @transform_1, window_bounds = array<i64: 16, 16>}, {pipeline_mode = #tpu.pipeline_mode<synchronous>, transform_indices = @transform_2, window_bounds = array<i64: 32, 96>}, {pipeline_mode = #tpu.pipeline_mode<synchronous>, transform_indices = @transform_3, window_bounds = array<i64: 1, 96>}, {pipeline_mode = #tpu.pipeline_mode<synchronous>, transform_indices = @transform_4, window_bounds = array<i64: 32, 32>}, {pipeline_mode = #tpu.pipeline_mode<synchronous>, transform_indices = @transform_5, window_bounds = array<i64: 1, 32>}, {pipeline_mode = #tpu.pipeline_mode<synchronous>, transform_indices = @transform_6, window_bounds = array<i64: 16, 32>}]} {
    %c0 = arith.constant 0 : index
    %c0_0 = arith.constant 0 : index
    %0 = vector.load %arg1[%c0, %c0_0] : memref<16x32xf32, #tpu.memory_space<vmem>>, vector<16x32xf32>
    %c0_1 = arith.constant 0 : index
    %c0_2 = arith.constant 0 : index
    %1 = vector.load %arg2[%c0_1, %c0_2] : memref<16x16xf32, #tpu.memory_space<vmem>>, vector<16x16xf32>
    %c0_3 = arith.constant 0 : index
    %c0_4 = arith.constant 0 : index
    %2 = vector.load %arg5[%c0_3, %c0_4] : memref<32x32xf32, #tpu.memory_space<vmem>>, vector<32x32xf32>
    %c0_5 = arith.constant 0 : index
    %c0_6 = arith.constant 0 : index
    %3 = vector.load %arg3[%c0_5, %c0_6] : memref<32x96xf32, #tpu.memory_space<vmem>>, vector<32x96xf32>
    %cst = arith.constant dense<0.000000e+00> : vector<16x96xf32>
    %4 = tpu.matmul %0, %3, %cst {dimension_numbers = #tpu.dot_dimension_numbers<[1], [0], [0], [1], [0, 0, 1, 1], [], []>} : vector<16x32xf32>, vector<32x96xf32>, vector<16x96xf32> -> vector<16x96xf32>
    %c0_7 = arith.constant 0 : index
    %c0_8 = arith.constant 0 : index
    %5 = vector.load %arg4[%c0_7, %c0_8] : memref<1x96xf32, #tpu.memory_space<vmem>>, vector<1x96xf32>
    %6 = vector.broadcast %5 : vector<1x96xf32> to vector<16x96xf32>
    %7 = arith.addf %4, %6 : vector<16x96xf32>
    %8 = vector.extract_strided_slice %7 {offsets = [0, 0], sizes = [16, 8], strides = [1, 1]} : vector<16x96xf32> to vector<16x8xf32>
    %9 = vector.extract_strided_slice %7 {offsets = [0, 32], sizes = [16, 8], strides = [1, 1]} : vector<16x96xf32> to vector<16x8xf32>
    %cst_9 = arith.constant dense<0.000000e+00> : vector<16x16xf32>
    %10 = tpu.matmul %8, %9, %cst_9 {dimension_numbers = #tpu.dot_dimension_numbers<[1], [1], [0], [0], [0, 0, 1, 0], [], []>} : vector<16x8xf32>, vector<16x8xf32>, vector<16x16xf32> -> vector<16x16xf32>
    %11 = arith.addf %10, %1 : vector<16x16xf32>
    %12 = vector.extract_strided_slice %7 {offsets = [0, 8], sizes = [16, 8], strides = [1, 1]} : vector<16x96xf32> to vector<16x8xf32>
    %13 = vector.extract_strided_slice %7 {offsets = [0, 40], sizes = [16, 8], strides = [1, 1]} : vector<16x96xf32> to vector<16x8xf32>
    %cst_10 = arith.constant dense<0.000000e+00> : vector<16x16xf32>
    %14 = tpu.matmul %12, %13, %cst_10 {dimension_numbers = #tpu.dot_dimension_numbers<[1], [1], [0], [0], [0, 0, 1, 0], [], []>} : vector<16x8xf32>, vector<16x8xf32>, vector<16x16xf32> -> vector<16x16xf32>
    %15 = arith.addf %14, %1 : vector<16x16xf32>
    %16 = vector.extract_strided_slice %7 {offsets = [0, 16], sizes = [16, 8], strides = [1, 1]} : vector<16x96xf32> to vector<16x8xf32>
    %17 = vector.extract_strided_slice %7 {offsets = [0, 48], sizes = [16, 8], strides = [1, 1]} : vector<16x96xf32> to vector<16x8xf32>
    %cst_11 = arith.constant dense<0.000000e+00> : vector<16x16xf32>
    %18 = tpu.matmul %16, %17, %cst_11 {dimension_numbers = #tpu.dot_dimension_numbers<[1], [1], [0], [0], [0, 0, 1, 0], [], []>} : vector<16x8xf32>, vector<16x8xf32>, vector<16x16xf32> -> vector<16x16xf32>
    %19 = arith.addf %18, %1 : vector<16x16xf32>
    %20 = vector.extract_strided_slice %7 {offsets = [0, 24], sizes = [16, 8], strides = [1, 1]} : vector<16x96xf32> to vector<16x8xf32>
    %21 = vector.extract_strided_slice %7 {offsets = [0, 56], sizes = [16, 8], strides = [1, 1]} : vector<16x96xf32> to vector<16x8xf32>
    %cst_12 = arith.constant dense<0.000000e+00> : vector<16x16xf32>
    %22 = tpu.matmul %20, %21, %cst_12 {dimension_numbers = #tpu.dot_dimension_numbers<[1], [1], [0], [0], [0, 0, 1, 0], [], []>} : vector<16x8xf32>, vector<16x8xf32>, vector<16x16xf32> -> vector<16x16xf32>
    %23 = arith.addf %22, %1 : vector<16x16xf32>
    %24 = tpu.concatenate %11, %15, %19, %23 in 0 : vector<16x16xf32>, vector<16x16xf32>, vector<16x16xf32>, vector<16x16xf32> -> vector<64x16xf32>
    %cst_13 = arith.constant dense<0xFF800000> : vector<64xf32>
    %25 = vector.multi_reduction <maximumf>, %24, %cst_13 [1] : vector<64x16xf32> to vector<64xf32>
    %26 = vector.shape_cast %25 : vector<64xf32> to vector<64x1xf32>
    %27 = vector.broadcast %26 : vector<64x1xf32> to vector<64x16xf32>
    %28 = arith.subf %24, %27 : vector<64x16xf32>
    %29 = math.exp %28 : vector<64x16xf32>
    %cst_14 = arith.constant dense<0.000000e+00> : vector<64xf32>
    %30 = vector.multi_reduction <add>, %29, %cst_14 [1] : vector<64x16xf32> to vector<64xf32>
    %31 = vector.shape_cast %30 : vector<64xf32> to vector<64x1xf32>
    %32 = vector.broadcast %31 : vector<64x1xf32> to vector<64x16xf32>
    %33 = arith.divf %29, %32 : vector<64x16xf32>
    %34 = vector.extract_strided_slice %33 {offsets = [0, 0], sizes = [16, 16], strides = [1, 1]} : vector<64x16xf32> to vector<16x16xf32>
    %35 = vector.extract_strided_slice %7 {offsets = [0, 64], sizes = [16, 8], strides = [1, 1]} : vector<16x96xf32> to vector<16x8xf32>
    %cst_15 = arith.constant dense<0.000000e+00> : vector<16x8xf32>
    %36 = tpu.matmul %34, %35, %cst_15 {dimension_numbers = #tpu.dot_dimension_numbers<[1], [0], [0], [1], [0, 0, 1, 1], [], []>} : vector<16x16xf32>, vector<16x8xf32>, vector<16x8xf32> -> vector<16x8xf32>
    %37 = vector.extract_strided_slice %2 {offsets = [0, 0], sizes = [8, 32], strides = [1, 1]} : vector<32x32xf32> to vector<8x32xf32>
    %cst_16 = arith.constant dense<0.000000e+00> : vector<16x32xf32>
    %38 = tpu.matmul %36, %37, %cst_16 {dimension_numbers = #tpu.dot_dimension_numbers<[1], [0], [0], [1], [0, 0, 1, 1], [], []>} : vector<16x8xf32>, vector<8x32xf32>, vector<16x32xf32> -> vector<16x32xf32>
    %39 = vector.extract_strided_slice %33 {offsets = [16, 0], sizes = [16, 16], strides = [1, 1]} : vector<64x16xf32> to vector<16x16xf32>
    %40 = vector.extract_strided_slice %7 {offsets = [0, 72], sizes = [16, 8], strides = [1, 1]} : vector<16x96xf32> to vector<16x8xf32>
    %cst_17 = arith.constant dense<0.000000e+00> : vector<16x8xf32>
    %41 = tpu.matmul %39, %40, %cst_17 {dimension_numbers = #tpu.dot_dimension_numbers<[1], [0], [0], [1], [0, 0, 1, 1], [], []>} : vector<16x16xf32>, vector<16x8xf32>, vector<16x8xf32> -> vector<16x8xf32>
    %42 = vector.extract_strided_slice %2 {offsets = [8, 0], sizes = [8, 32], strides = [1, 1]} : vector<32x32xf32> to vector<8x32xf32>
    %cst_18 = arith.constant dense<0.000000e+00> : vector<16x32xf32>
    %43 = tpu.matmul %41, %42, %cst_18 {dimension_numbers = #tpu.dot_dimension_numbers<[1], [0], [0], [1], [0, 0, 1, 1], [], []>} : vector<16x8xf32>, vector<8x32xf32>, vector<16x32xf32> -> vector<16x32xf32>
    %44 = arith.addf %38, %43 : vector<16x32xf32>
    %45 = vector.extract_strided_slice %33 {offsets = [32, 0], sizes = [16, 16], strides = [1, 1]} : vector<64x16xf32> to vector<16x16xf32>
    %46 = vector.extract_strided_slice %7 {offsets = [0, 80], sizes = [16, 8], strides = [1, 1]} : vector<16x96xf32> to vector<16x8xf32>
    %cst_19 = arith.constant dense<0.000000e+00> : vector<16x8xf32>
    %47 = tpu.matmul %45, %46, %cst_19 {dimension_numbers = #tpu.dot_dimension_numbers<[1], [0], [0], [1], [0, 0, 1, 1], [], []>} : vector<16x16xf32>, vector<16x8xf32>, vector<16x8xf32> -> vector<16x8xf32>
    %48 = vector.extract_strided_slice %2 {offsets = [16, 0], sizes = [8, 32], strides = [1, 1]} : vector<32x32xf32> to vector<8x32xf32>
    %cst_20 = arith.constant dense<0.000000e+00> : vector<16x32xf32>
    %49 = tpu.matmul %47, %48, %cst_20 {dimension_numbers = #tpu.dot_dimension_numbers<[1], [0], [0], [1], [0, 0, 1, 1], [], []>} : vector<16x8xf32>, vector<8x32xf32>, vector<16x32xf32> -> vector<16x32xf32>
    %50 = arith.addf %44, %49 : vector<16x32xf32>
    %51 = vector.extract_strided_slice %33 {offsets = [48, 0], sizes = [16, 16], strides = [1, 1]} : vector<64x16xf32> to vector<16x16xf32>
    %52 = vector.extract_strided_slice %7 {offsets = [0, 88], sizes = [16, 8], strides = [1, 1]} : vector<16x96xf32> to vector<16x8xf32>
    %cst_21 = arith.constant dense<0.000000e+00> : vector<16x8xf32>
    %53 = tpu.matmul %51, %52, %cst_21 {dimension_numbers = #tpu.dot_dimension_numbers<[1], [0], [0], [1], [0, 0, 1, 1], [], []>} : vector<16x16xf32>, vector<16x8xf32>, vector<16x8xf32> -> vector<16x8xf32>
    %54 = vector.extract_strided_slice %2 {offsets = [24, 0], sizes = [8, 32], strides = [1, 1]} : vector<32x32xf32> to vector<8x32xf32>
    %cst_22 = arith.constant dense<0.000000e+00> : vector<16x32xf32>
    %55 = tpu.matmul %53, %54, %cst_22 {dimension_numbers = #tpu.dot_dimension_numbers<[1], [0], [0], [1], [0, 0, 1, 1], [], []>} : vector<16x8xf32>, vector<8x32xf32>, vector<16x32xf32> -> vector<16x32xf32>
    %56 = arith.addf %50, %55 : vector<16x32xf32>
    %c0_23 = arith.constant 0 : index
    %c0_24 = arith.constant 0 : index
    %57 = vector.load %arg6[%c0_23, %c0_24] : memref<1x32xf32, #tpu.memory_space<vmem>>, vector<1x32xf32>
    %58 = vector.broadcast %57 : vector<1x32xf32> to vector<16x32xf32>
    %59 = arith.addf %56, %58 : vector<16x32xf32>
    %c0_25 = arith.constant 0 : index
    %c0_26 = arith.constant 0 : index
    %60 = vector.load %arg7[%c0_25, %c0_26] : memref<16x32xf32, #tpu.memory_space<vmem>>, vector<16x32xf32>
    tpu.vector_store %arg7[%c0_25, %c0_26], %59 {strides = array<i32>} : memref<16x32xf32, #tpu.memory_space<vmem>>, vector<16x32xf32>,
    return
  }
  func.func @transform_0(%arg0: i32) -> (i32, i32) {
    %c0_i32 = arith.constant 0 : i32
    %c0_i32_0 = arith.constant 0 : i32
    %c0_i32_1 = arith.constant 0 : i32
    return %c0_i32, %c0_i32_0 : i32, i32
  }
  func.func @transform_1(%arg0: i32) -> (i32, i32) {
    %c0_i32 = arith.constant 0 : i32
    %c0_i32_0 = arith.constant 0 : i32
    %c0_i32_1 = arith.constant 0 : i32
    return %c0_i32, %c0_i32_0 : i32, i32
  }
  func.func @transform_2(%arg0: i32) -> (i32, i32) {
    %c0_i32 = arith.constant 0 : i32
    %c0_i32_0 = arith.constant 0 : i32
    %c0_i32_1 = arith.constant 0 : i32
    return %c0_i32, %c0_i32_0 : i32, i32
  }
  func.func @transform_3(%arg0: i32) -> (i32, i32) {
    %c0_i32 = arith.constant 0 : i32
    %c0_i32_0 = arith.constant 0 : i32
    %c0_i32_1 = arith.constant 0 : i32
    return %c0_i32, %c0_i32_0 : i32, i32
  }
  func.func @transform_4(%arg0: i32) -> (i32, i32) {
    %c0_i32 = arith.constant 0 : i32
    %c0_i32_0 = arith.constant 0 : i32
    %c0_i32_1 = arith.constant 0 : i32
    return %c0_i32, %c0_i32_0 : i32, i32
  }
  func.func @transform_5(%arg0: i32) -> (i32, i32) {
    %c0_i32 = arith.constant 0 : i32
    %c0_i32_0 = arith.constant 0 : i32
    %c0_i32_1 = arith.constant 0 : i32
    return %c0_i32, %c0_i32_0 : i32, i32
  }
  func.func @transform_6(%arg0: i32) -> (i32, i32) {
    %c0_i32 = arith.constant 0 : i32
    %c0_i32_0 = arith.constant 0 : i32
    %c0_i32_1 = arith.constant 0 : i32
    return %c0_i32, %c0_i32_0 : i32, i32
  }
}

</mosaic_0001>

<bundles_post_ra>
// kernel: bert_attention.1
= control target key start
LH: loop header
LB: loop body
LE: loop exit
PB: predicated region body
PF: predicated region fallthrough
CT: control target
= control target key end

     0   :  { %11 = vsyncpa [#allocation3], 0  ;;  %s1159_s0 = inlined_call_operand.vmem [shape: f32[16,32], index: 0, kind: input, shape index: {}]   ;;  %s1160_s1 = inlined_call_operand.vmem [shape: f32[16,16], index: 1, kind: input, shape index: {}]   ;;  %s1161_s2 = inlined_call_operand.hbm [shape: f32[32,96], index: 2, kind: input, shape index: {}]   ;;  %s1162_s3 = inlined_call_operand.vmem [shape: f32[1,96], index: 3, kind: input, shape index: {}]   ;;  %s1163_s4 = inlined_call_operand.hbm [shape: f32[32,32], index: 4, kind: input, shape index: {}]   ;;  %s1164_s5 = inlined_call_operand.vmem [shape: f32[1,32], index: 5, kind: input, shape index: {}]   ;;  %s1165_s6 = inlined_call_operand.hbm [shape: f32[16,32], index: 6, kind: output, shape index: {}]  }
   0x1   :  { %12 = vsyncpa [#allocation6], 0 }
   0x2   :  { %13 = vsyncpa [#allocation4], 0  ;;  %s22_s23 = sshll.u32 %s1161_s2, 4  ;;  %s924_s24 = smov [#allocation2]   ;;  %s23_s23 = int_to_ptr.hbm [resolvable:$true] %s22_s23 }
   0x3   :  { %s24_s25 = sshll.u32 %s924_s24, 4  ;;  %s37_s28 = sshll.u32 %s1163_s4, 4  ;;  %s25_s25 = int_to_ptr.vmem [resolvable:$true] %s24_s25  ;;  %s38_s28 = int_to_ptr.hbm [resolvable:$true] %s37_s28 }
   0x4   :  { %s925_s29 = smov 128   ;;  %s926_s30 = smov 8  }
   0x5   :  { %30 = dma.hbm_to_vmem [thread:$0]  %s23_s23, 512, %s25_s25, [#allocation3], %s925_s29, %s925_s29, %s926_s30  }
   0x6   :  { %s927_s7 = smov [#allocation5]  }
   0x7   :  { %s39_s8 = sshll.u32 %s927_s7, 4  ;;  %s40_s8 = int_to_ptr.vmem [resolvable:$true] %s39_s8 }
   0x8   :  { %45 = dma.hbm_to_vmem [thread:$0]  %s38_s28, 512, %s40_s8, [#allocation6], %s925_s29, %s925_s29, %s926_s30  }
   0x9   :  { %918 = dma.done.wait [#allocation3], 512  }
   0xa   :  { %919 = vsyncadd [#allocation3], 4294966784 }
   0xb   :  { %920 = dma.done.wait [#allocation6], 512  }
   0xc   :  { %921 = vsyncadd [#allocation6], 4294966784  ;;  %v67_v0 = vld [vmem:[#allocation2 + $0x18] sm:$0xff]  ;;  %v66_v1 = vld [vmem:[#allocation2 + $0x10] sm:$0xff]  ;;  %vm72_vm0 = vcmask 261120   ;;  %s928_s13 = smov 96  }
   0xd   :  { %91 = vmatpush.msra.mxu0 %v67_v0  ;;  %772 = vmatpush.msra.mxu1 %v67_v0  ;;  %v65_v2 = vld [vmem:[#allocation2 + $0x8] sm:$0xff]  ;;  %v64_v3 = vld [vmem:[#allocation2] sm:$0xff]  ;;  %s930_s14 = smov 120   ;;  %s932_s15 = smov 80   ;;  %vm108_vm1 = vcmask 64512   ;;  %vm257_vm2 = vcmask 130048  }
   0xe   :  { %v56_v4 = vld [vmem:[%s1159_s0] sm:$0xff]  ;;  %v57_v5 = vld [vmem:[%s1159_s0 + $0x8] sm:$0xff]  ;;  %s929_s0 = smov 88   ;;  %s933_s16 = smov 72  }
   0xf   :  { %92 = vmatpush.msra.mxu0 %v66_v1  ;;  %773 = vmatpush.msra.mxu1 %v66_v1  ;;  %v812_v6 = vld [vmem:[%s1162_s3] ss:$0 sm:$0xff]  ;;  %s931_s3 = smov 112   ;;  %s934_s17 = smov 104   ;;  %v59_v29 = vld [vmem:[%s1160_s1 + $0x8] sm:$0xff] }
  0x10   :  { %v58_v25 = vld [vmem:[%s1160_s1] sm:$0xff]  ;;  %s935_s1 = smov 56   ;;  %s936_s22 = smov 64  }
  0x11   :  { %93 = vmatpush.msra.mxu0 %v65_v2  ;;  %774 = vmatpush.msra.mxu1 %v65_v2  ;;  %s937_s23 = smov 48   ;;  %s938_s24 = smov 40  }
  0x12   :  { %s939_s27 = smov [#allocation7]   ;;  %s724_s2 = sshll.u32 %s1165_s6, 4  ;;  %s725_s2 = int_to_ptr.hbm [resolvable:$true] %s724_s2 }
  0x13   :  { %94 = vmatpush.msra.mxu0 %v64_v3  ;;  %775 = vmatpush.msra.mxu1 %v64_v3  ;;  %s722_s28 = sshll.u32 %s939_s27, 4  ;;  %s723_s28 = int_to_ptr.vmem [resolvable:$true] %s722_s28 }
  0x14   :  { %738 = vmatmul.msk.f32.vlgmr.msra.gmra.mxu0 %vm72_vm0, %v56_v4  ;;  %739 = vmatmul.msk.f32.vlgmr.msra.gmra.mxu1 %vm72_vm0, %v57_v5 }
  0x91   :  { %v96_v7 = vpop.f32.mrf.mxu0  ;;  %v99_v8 = vpop.f32.mrf.mxu1 }
  0x92   :  { %v998_v9 = vadd.f32 %v812_v6, %v96_v7  ;;  %v1000_v10 = vadd.f32 %v812_v6, %v99_v8 }
  0x94   :  { %106 = vrot.lane.b32.xlu2 %v1000_v10, %s928_s13  ;;  %146 = vrot.lane.b32.xlu0 %v1000_v10, %s929_s0  ;;  %v1066_v2 = vpack.i.bf16 %v998_v9, %v1000_v10 }
  0x95   :  { %140 = vrot.lane.b32.xlu1 %v998_v9, %s930_s14 }
  0x9c   :  { %104 = vrot.lane.b32.xlu2 %v998_v9, %s928_s13  ;;  %144 = vrot.lane.b32.xlu0 %v998_v9, %s929_s0 }
  0x9d   :  { %142 = vrot.lane.b32.xlu1 %v1000_v10, %s930_s14 }
  0xa4   :  { %179 = vrot.lane.b32.xlu2 %v998_v9, %s931_s3  ;;  %185 = vrot.lane.b32.xlu0 %v1000_v10, %s932_s15 }
  0xa5   :  { %183 = vrot.lane.b32.xlu1 %v998_v9, %s932_s15 }
  0xac   :  { %181 = vrot.lane.b32.xlu2 %v1000_v10, %s931_s3  ;;  %224 = vrot.lane.b32.xlu0 %v1000_v10, %s933_s16 }
  0xad   :  { %222 = vrot.lane.b32.xlu1 %v998_v9, %s933_s16 }
  0xb4   :  { %218 = vrot.lane.b32.xlu0 %v998_v9, %s934_s17 }
  0xb5   :  { %220 = vrot.lane.b32.xlu1 %v1000_v10, %s934_s17 }
  0xee   :  { %v107_v11 = vpop.permute.xlu2 %106 }
  0xef   :  { %740 = vmatpush.xpose.msk.msrb.mxu1 %vm108_vm1, %v107_v11 }
  0xf6   :  { %v105_v12 = vpop.permute.xlu2 %104 }
  0xf7   :  { %741 = vmatpush.xpose.msk.msrb.mxu1 %vm108_vm1, %v105_v12 }
  0xfa   :  { %742 = vmatmul.msk.f32.vlgmr.msrb.gmra.mxu1 %vm108_vm1, %v998_v9 }
  0xfe   :  { %v180_v19 = vpop.permute.xlu2 %179 }
 0x102   :  { %743 = vmatmul.msk.f32.gmra.mxu1 %vm108_vm1, %v1000_v10 }
 0x106   :  { %v147_v13 = vpop.permute.xlu0 %146  ;;  %v182_v22 = vpop.permute.xlu2 %181 }
 0x107   :  { %v141_v14 = vpop.permute.xlu1 %140  ;;  %744 = vmatpush.xpose.msk.msra.mxu2 %vm108_vm1, %v147_v13 }
 0x10e   :  { %v145_v15 = vpop.permute.xlu0 %144 }
 0x10f   :  { %v143_v16 = vpop.permute.xlu1 %142  ;;  %745 = vmatpush.xpose.msk.msra.mxu2 %vm108_vm1, %v145_v15 }
 0x112   :  { %746 = vmatmul.msk.f32.vlgmr.msra.gmra.mxu2 %vm108_vm1, %v141_v14 }
 0x116   :  { %v186_v17 = vpop.permute.xlu0 %185 }
 0x117   :  { %748 = vmatpush.xpose.msk.msra.mxu3 %vm108_vm1, %v186_v17  ;;  %v184_v18 = vpop.permute.xlu1 %183 }
 0x11a   :  { %747 = vmatmul.msk.f32.gmra.mxu2 %vm108_vm1, %v143_v16 }
 0x11b   :  { %749 = vmatpush.xpose.msk.msra.mxu3 %vm108_vm1, %v184_v18 }
 0x11e   :  { %750 = vmatmul.msk.f32.vlgmr.msra.gmra.mxu3 %vm108_vm1, %v180_v19  ;;  %v225_v20 = vpop.permute.xlu0 %224 }
 0x11f   :  { %752 = vmatpush.xpose.msk.msrb.mxu0 %vm108_vm1, %v225_v20  ;;  %v223_v21 = vpop.permute.xlu1 %222 }
 0x123   :  { %753 = vmatpush.xpose.msk.msrb.mxu0 %vm108_vm1, %v223_v21 }
 0x126   :  { %751 = vmatmul.msk.f32.gmra.mxu3 %vm108_vm1, %v182_v22  ;;  %v219_v23 = vpop.permute.xlu0 %218 }
 0x127   :  { %754 = vmatmul.msk.f32.vlgmr.msrb.gmra.mxu0 %vm108_vm1, %v219_v23  ;;  %v221_v24 = vpop.permute.xlu1 %220 }
 0x12f   :  { %755 = vmatmul.msk.f32.gmra.mxu0 %vm108_vm1, %v221_v24 }
 0x177   :  { %v134_v33 = vpop.f32.mrf.mxu1 }
 0x178   :  { %v135_v34 = vadd.f32 %v134_v33, %v58_v25 }
 0x17a   :  { %v258_v36 = vsel %vm257_vm2, %v135_v34, -inf }
 0x17f   :  { %v137_v50 = vpop.f32.mrf.mxu1 }
 0x180   :  { %v138_v51 = vadd.f32 %v137_v50, %v59_v29 }
 0x182   :  { %v261_v55 = vsel %vm257_vm2, %v138_v51, -inf }
 0x195   :  { %v173_v26 = vpop.f32.mrf.mxu2 }
 0x196   :  { %v174_v27 = vadd.f32 %v173_v26, %v58_v25 }
 0x198   :  { %v264_v28 = vsel %vm257_vm2, %v174_v27, -inf }
 0x199   :  { %265 = vmax.xlane.f32.xlu2 %v264_v28 }
 0x19d   :  { %v176_v30 = vpop.f32.mrf.mxu2 }
 0x19e   :  { %v177_v31 = vadd.f32 %v176_v30, %v59_v29 }
 0x1a0   :  { %v267_v32 = vsel %vm257_vm2, %v177_v31, -inf }
 0x1a1   :  { %268 = vmax.xlane.f32.xlu0 %v267_v32  ;;  %v212_v35 = vpop.f32.mrf.mxu3 }
 0x1a2   :  { %v213_v37 = vadd.f32 %v212_v35, %v58_v25 }
 0x1a4   :  { %v270_v38 = vsel %vm257_vm2, %v213_v37, -inf  ;;  %v251_v54 = vpop.f32.mrf.mxu0 }
 0x1a5   :  { %v252_v57 = vadd.f32 %v251_v54, %v58_v25 }
 0x1a7   :  { %v276_v60 = vsel %vm257_vm2, %v252_v57, -inf }
 0x1a9   :  { %259 = vmax.xlane.f32.xlu0 %v258_v36  ;;  %v215_v39 = vpop.f32.mrf.mxu3 }
 0x1aa   :  { %v1044_v40 = vadd.f32 %v215_v39, %v59_v29 }
 0x1ac   :  { %v273_v41 = vsel %vm257_vm2, %v1044_v40, -inf  ;;  %v254_v61 = vpop.f32.mrf.mxu0 }
 0x1ad   :  { %v1058_v63 = vadd.f32 %v254_v61, %v59_v29 }
 0x1af   :  { %v279_v0 = vsel %vm257_vm2, %v1058_v63, -inf }
 0x1b1   :  { %271 = vmax.xlane.f32.xlu0 %v270_v38 }
 0x1b9   :  { %274 = vmax.xlane.f32.xlu0 %v273_v41 }
 0x20c   :  { %v266_v42 = vpop.xlane.xlu2 %265 }
 0x20d   :  { %v284_v43 = vsub.f32 %v174_v27, %v266_v42 }
 0x20f   :  { %v294_v44 = vmul.f32 1.442695, %v284_v43 }
 0x211   :  { %814 = vpow2.f32 %v294_v44 }
 0x214   :  { %v269_v45 = vpop.xlane.xlu0 %268 }
 0x215   :  { %v285_v46 = vsub.f32 %v177_v31, %v269_v45 }
 0x217   :  { %v1048_v47 = vpop.eup %814  ;;  %v296_v48 = vmul.f32 1.442695, %v285_v46 }
 0x218   :  { %v312_v49 = vsel %vm257_vm2, %v1048_v47, 0.0 }
 0x219   :  { %816 = vpow2.f32 %v296_v48  ;;  %313 = vadd.xlane.f32.xlu1 %v312_v49 }
 0x21c   :  { %v260_v52 = vpop.xlane.xlu0 %259 }
 0x21d   :  { %v282_v4 = vsub.f32 %v135_v34, %v260_v52 }
 0x21f   :  { %v1052_v53 = vpop.eup %816  ;;  %v290_v5 = vmul.f32 1.442695, %v282_v4 }
 0x220   :  { %v315_v56 = vsel %vm257_vm2, %v1052_v53, 0.0 }
 0x221   :  { %262 = vmax.xlane.f32.xlu1 %v261_v55  ;;  %316 = vadd.xlane.f32.xlu2 %v315_v56 }
 0x224   :  { %v272_v58 = vpop.xlane.xlu0 %271 }
 0x225   :  { %v286_v59 = vsub.f32 %v213_v37, %v272_v58 }
 0x227   :  { %v298_v62 = vmul.f32 1.442695, %v286_v59 }
 0x229   :  { %277 = vmax.xlane.f32.xlu1 %v276_v60  ;;  %818 = vpow2.f32 %v298_v62 }
 0x22a   :  { %820 = vpow2.f32 %v290_v5 }
 0x22c   :  { %v275_v41 = vpop.xlane.xlu0 %274 }
 0x22f   :  { %v1062_v1 = vpop.eup %818 }
 0x230   :  { %v318_v3 = vsel %vm257_vm2, %v1062_v1, 0.0  ;;  %v1071_v6 = vpop.eup %820 }
 0x231   :  { %280 = vmax.xlane.f32.xlu1 %v279_v0  ;;  %v306_v7 = vsel %vm257_vm2, %v1071_v6, 0.0 }
 0x239   :  { %793 = vrot.lane.b32.xlu2 %v1066_v2, %s935_s1  ;;  %319 = vadd.xlane.f32.xlu1 %v318_v3 }
 0x262   :  { %307 = vadd.xlane.f32.xlu2 %v306_v7 }
 0x28c   :  { %v314_v8 = vpop.xlane.xlu1 %313 }
 0x28d   :  { %822 = vrcp.f32 %v314_v8  ;;  %v371_v15 = vand.u32 2147483648, %v314_v8  ;;  %v369_v18 = vand.u32 2147483647, %v314_v8  ;;  %vm365_vm4 = vweird.f32 %v314_v8 }
 0x28f   :  { %v372_v21 = vor.u32 1.1754944e-38, %v371_v15  ;;  %vm370_vm6 = vcmp.eq.f32.partialorder %v369_v18, 8.507059e+37 }
 0x293   :  { %v823_v9 = vpop.eup %822 }
 0x294   :  { %v361_v10 = vmul.f32 %v823_v9, %v314_v8  ;;  %v263_v11 = vpop.xlane.xlu1 %262  ;;  %v317_v12 = vpop.xlane.xlu2 %316  ;;  %vm366_vm3 = vweird.f32 %v823_v9 }
 0x295   :  { %v283_v13 = vsub.f32 %v138_v51, %v263_v11  ;;  %824 = vrcp.f32 %v317_v12  ;;  %vm367_vm5 = vmor %vm365_vm4, %vm366_vm3  ;;  %v386_v31 = vand.u32 2147483648, %v317_v12  ;;  %v384_v34 = vand.u32 2147483647, %v317_v12 }
 0x296   :  { %v362_v14 = vsub.f32 1.0, %v361_v10  ;;  %vm380_vm8 = vweird.f32 %v317_v12 }
 0x297   :  { %v292_v16 = vmul.f32 1.442695, %v283_v13  ;;  %v387_v39 = vor.u32 1.1754944e-38, %v386_v31  ;;  %vm385_vm10 = vcmp.eq.f32.partialorder %v384_v34, 8.507059e+37 }
 0x298   :  { %v363_v17 = vmul.f32 %v823_v9, %v362_v14 }
 0x299   :  { %826 = vpow2.f32 %v292_v16 }
 0x29a   :  { %v364_v19 = vadd.f32 %v823_v9, %v363_v17 }
 0x29b   :  { %v825_v20 = vpop.eup %824 }
 0x29c   :  { %v376_v22 = vmul.f32 %v825_v20, %v317_v12  ;;  %v278_v23 = vpop.xlane.xlu1 %277  ;;  %v794_v24 = vpop.permute.xlu2 %793  ;;  %v368_v25 = vsel %vm367_vm5, %v823_v9, %v364_v19  ;;  %vm381_vm7 = vweird.f32 %v825_v20 }
 0x29d   :  { %v288_v26 = vsub.f32 %v252_v57, %v278_v23  ;;  %v795_v27 = vunpack.i.l.bf16 %v794_v24  ;;  %v373_v28 = vsel %vm370_vm6, %v372_v21, %v368_v25  ;;  %v796_v33 = vunpack.i.h.bf16 %v794_v24  ;;  %vm382_vm9 = vmor %vm380_vm8, %vm381_vm7 }
 0x29e   :  { %v377_v29 = vsub.f32 1.0, %v376_v22  ;;  %v374_v37 = vmul.f32 %v1048_v47, %v373_v28  ;;  %v287_v47 = vsub.f32 %v1044_v40, %v275_v41 }
 0x29f   :  { %v1075_v30 = vpop.eup %826  ;;  %v302_v32 = vmul.f32 1.442695, %v288_v26  ;;  %511 = vmatpush.msrb.mxu2 %v795_v27 }
 0x2a0   :  { %v378_v35 = vmul.f32 %v825_v20, %v377_v29  ;;  %v309_v36 = vsel %vm257_vm2, %v1075_v30, 0.0  ;;  %v300_v51 = vmul.f32 1.442695, %v287_v47 }
 0x2a1   :  { %828 = vpow2.f32 %v302_v32  ;;  %310 = vadd.xlane.f32.xlu0 %v309_v36  ;;  %512 = vmatpush.msrb.mxu2 %v796_v33 }
 0x2a2   :  { %758 = vmatmul.msk.f32.vlgmr.msrb.gmra.mxu2 %vm257_vm2, %v374_v37  ;;  %v379_v38 = vadd.f32 %v825_v20, %v378_v35 }
 0x2a4   :  { %v281_v42 = vpop.xlane.xlu1 %280  ;;  %v383_v43 = vsel %vm382_vm9, %v825_v20, %v379_v38 }
 0x2a5   :  { %v289_v44 = vsub.f32 %v1058_v63, %v281_v42  ;;  %v388_v45 = vsel %vm385_vm10, %v387_v39, %v383_v43 }
 0x2a6   :  { %v389_v50 = vmul.f32 %v1052_v53, %v388_v45  ;;  %v61_v53 = vld [vmem:[#allocation5 + $0x8] sm:$0xff] }
 0x2a7   :  { %v1082_v46 = vpop.eup %828  ;;  %v304_v48 = vmul.f32 1.442695, %v289_v44  ;;  %541 = vmatpush.msrb.mxu3 %v61_v53 }
 0x2a8   :  { %v324_v49 = vsel %vm257_vm2, %v1082_v46, 0.0 }
 0x2a9   :  { %830 = vpow2.f32 %v304_v48  ;;  %325 = vadd.xlane.f32.xlu1 %v324_v49 }
 0x2aa   :  { %759 = vmatmul.msk.f32.gmra.mxu2 %vm257_vm2, %v389_v50  ;;  %832 = vpow2.f32 %v300_v51 }
 0x2ac   :  { %v1100_v58 = vpop.xlane.xlu1 %319 }
 0x2ad   :  { %v401_v34 = vand.u32 2147483648, %v1100_v58  ;;  %vm395_vm7 = vweird.f32 %v1100_v58  ;;  %v399_v38 = vand.u32 2147483647, %v1100_v58 }
 0x2af   :  { %v1089_v52 = vpop.eup %830  ;;  %v402_v43 = vor.u32 1.1754944e-38, %v401_v34  ;;  %vm400_vm9 = vcmp.eq.f32.partialorder %v399_v38, 8.507059e+37 }
 0x2b0   :  { %v327_v54 = vsel %vm257_vm2, %v1089_v52, 0.0  ;;  %v1093_v55 = vpop.eup %832 }
 0x2b1   :  { %328 = vadd.xlane.f32.xlu1 %v327_v54  ;;  %v321_v40 = vsel %vm257_vm2, %v1093_v55, 0.0 }
 0x2b5   :  { %798 = vrot.lane.b32.xlu0 %v1066_v2, %s936_s22 }
 0x2b9   :  { %322 = vadd.xlane.f32.xlu1 %v321_v40 }
 0x2bd   :  { %803 = vrot.lane.b32.xlu0 %v1066_v2, %s937_s23 }
 0x2d2   :  { %808 = vrot.lane.b32.xlu1 %v1066_v2, %s938_s24 }
 0x2d5   :  { %v308_v56 = vpop.xlane.xlu2 %307 }
 0x2d6   :  { %834 = vrcp.f32 %v308_v56  ;;  %v341_v7 = vand.u32 2147483648, %v308_v56  ;;  %vm335_vm12 = vweird.f32 %v308_v56  ;;  %v339_v8 = vand.u32 2147483647, %v308_v56 }
 0x2d8   :  { %v342_v14 = vor.u32 1.1754944e-38, %v341_v7  ;;  %vm340_vm14 = vcmp.eq.f32.partialorder %v339_v8, 8.507059e+37 }
 0x2dc   :  { %v835_v57 = vpop.eup %834 }
 0x2dd   :  { %v331_v60 = vmul.f32 %v835_v57, %v308_v56  ;;  %vm336_vm11 = vweird.f32 %v835_v57 }
 0x2de   :  { %vm337_vm13 = vmor %vm335_vm12, %vm336_vm11 }
 0x2df   :  { %v332_v61 = vsub.f32 1.0, %v331_v60 }
 0x2e1   :  { %v333_v0 = vmul.f32 %v835_v57, %v332_v61 }
 0x2e3   :  { %v334_v4 = vadd.f32 %v835_v57, %v333_v0 }
 0x2e5   :  { %v338_v11 = vsel %vm337_vm13, %v835_v57, %v334_v4 }
 0x2e6   :  { %v343_v16 = vsel %vm340_vm14, %v342_v14, %v338_v11 }
 0x2e7   :  { %v344_v22 = vmul.f32 %v1071_v6, %v343_v16  ;;  %v60_v16 = vld [vmem:[#allocation5] sm:$0xff] }
 0x2e8   :  { %570 = vmatpush.msra.mxu0 %v60_v16 }
 0x314   :  { %v311_v59 = vpop.xlane.xlu0 %310 }
 0x315   :  { %836 = vrcp.f32 %v311_v59  ;;  %v356_v20 = vand.u32 2147483648, %v311_v59  ;;  %vm350_vm3 = vweird.f32 %v311_v59  ;;  %v354_v23 = vand.u32 2147483647, %v311_v59 }
 0x316   :  { %838 = vrcp.f32 %v1100_v58 }
 0x317   :  { %v357_v28 = vor.u32 1.1754944e-38, %v356_v20  ;;  %vm355_vm5 = vcmp.eq.f32.partialorder %v354_v23, 8.507059e+37 }
 0x31b   :  { %v837_v62 = vpop.eup %836 }
 0x31c   :  { %v1103_v63 = vpop.xlane.xlu1 %325  ;;  %v346_v3 = vmul.f32 %v837_v62, %v311_v59  ;;  %v1105_v5 = vpop.eup %838  ;;  %vm351_vm15 = vweird.f32 %v837_v62 }
 0x31d   :  { %v391_v10 = vmul.f32 %v1105_v5, %v1100_v58  ;;  %840 = vrcp.f32 %v1103_v63  ;;  %vm352_vm4 = vmor %vm350_vm3, %vm351_vm15  ;;  %vm396_vm6 = vweird.f32 %v1105_v5  ;;  %v431_v60 = vand.u32 2147483648, %v1103_v63 }
 0x31e   :  { %v347_v2 = vsub.f32 1.0, %v346_v3  ;;  %vm397_vm8 = vmor %vm395_vm7, %vm396_vm6  ;;  %vm425_vm15 = vweird.f32 %v1103_v63  ;;  %v429_v61 = vand.u32 2147483647, %v1103_v63 }
 0x31f   :  { %v392_v18 = vsub.f32 1.0, %v391_v10  ;;  %v432_v3 = vor.u32 1.1754944e-38, %v431_v60 }
 0x320   :  { %v348_v12 = vmul.f32 %v837_v62, %v347_v2 }
 0x321   :  { %v393_v25 = vmul.f32 %v1105_v5, %v392_v18  ;;  %v63_v18 = vld [vmem:[#allocation5 + $0x18] sm:$0xff] }
 0x322   :  { %v349_v19 = vadd.f32 %v837_v62, %v348_v12  ;;  %700 = vmatpush.msrb.mxu0 %v63_v18 }
 0x323   :  { %v841_v29 = vpop.eup %840  ;;  %v394_v33 = vadd.f32 %v1105_v5, %v393_v25 }
 0x324   :  { %v1107_v9 = vpop.xlane.xlu1 %328  ;;  %v353_v27 = vsel %vm352_vm4, %v837_v62, %v349_v19  ;;  %v421_v35 = vmul.f32 %v841_v29, %v1103_v63  ;;  %vm426_vm13 = vweird.f32 %v841_v29  ;;  %vm430_vm4 = vcmp.eq.f32.partialorder %v429_v61, 8.507059e+37 }
 0x325   :  { %v514_v13 = vpop.f32.mrf.mxu2  ;;  %v358_v6 = vsel %vm355_vm5, %v357_v28, %v353_v27  ;;  %v398_v42 = vsel %vm397_vm8, %v1105_v5, %v394_v33  ;;  %vm427_vm3 = vmor %vm425_vm15, %vm426_vm13  ;;  %v446_v10 = vand.u32 2147483648, %v1107_v9  ;;  %vm440_vm6 = vweird.f32 %v1107_v9 }
 0x326   :  { %760 = vmatmul.msk.f32.vlgmr.msrb.gmra.mxu3 %vm108_vm1, %v514_v13  ;;  %v359_v39 = vmul.f32 %v1075_v30, %v358_v6  ;;  %v422_v44 = vsub.f32 1.0, %v421_v35  ;;  %v403_v48 = vsel %vm400_vm9, %v402_v43, %v398_v42  ;;  %v444_v12 = vand.u32 2147483647, %v1107_v9 }
 0x327   :  { %v799_v15 = vpop.permute.xlu0 %798  ;;  %v404_v40 = vmul.f32 %v1062_v1, %v403_v48  ;;  %v447_v13 = vor.u32 1.1754944e-38, %v446_v10 }
 0x328   :  { %v800_v17 = vunpack.i.l.bf16 %v799_v15  ;;  %v801_v21 = vunpack.i.h.bf16 %v799_v15  ;;  %v423_v50 = vmul.f32 %v841_v29, %v422_v44  ;;  %vm445_vm8 = vcmp.eq.f32.partialorder %v444_v12, 8.507059e+37 }
 0x32a   :  { %476 = vmatpush.msra.mxu1 %v800_v17  ;;  %v424_v57 = vadd.f32 %v841_v29, %v423_v50  ;;  %v62_v17 = vld [vmem:[#allocation5 + $0x10] sm:$0xff] }
 0x32b   :  { %634 = vmatpush.msra.mxu2 %v62_v17 }
 0x32c   :  { %v323_v24 = vpop.xlane.xlu1 %322  ;;  %477 = vmatpush.msra.mxu1 %v801_v21  ;;  %v428_v0 = vsel %vm427_vm3, %v841_v29, %v424_v57  ;;  %v813_v29 = vld [vmem:[%s1164_s5] ss:$0 sm:$0xff] }
 0x32d   :  { %842 = vrcp.f32 %v323_v24  ;;  %756 = vmatmul.msk.f32.vlgmr.msra.gmra.mxu1 %vm257_vm2, %v344_v22  ;;  %v517_v26 = vpop.f32.mrf.mxu2  ;;  %v416_v54 = vand.u32 2147483648, %v323_v24  ;;  %vm410_vm11 = vweird.f32 %v323_v24  ;;  %v414_v53 = vand.u32 2147483647, %v323_v24 }
 0x32e   :  { %761 = vmatmul.msk.f32.gmra.mxu3 %vm108_vm1, %v517_v26  ;;  %844 = vrcp.f32 %v1107_v9  ;;  %v433_v5 = vsel %vm430_vm4, %v432_v3, %v428_v0 }
 0x32f   :  { %v804_v31 = vpop.permute.xlu0 %803  ;;  %v417_v59 = vor.u32 1.1754944e-38, %v416_v54  ;;  %vm415_vm14 = vcmp.eq.f32.partialorder %v414_v53, 8.507059e+37  ;;  %v434_v63 = vmul.f32 %v1082_v46, %v433_v5 }
 0x330   :  { %v805_v32 = vunpack.i.l.bf16 %v804_v31  ;;  %v806_v36 = vunpack.i.h.bf16 %v804_v31 }
 0x332   :  { %604 = vmatpush.msrb.mxu1 %v805_v32 }
 0x333   :  { %v843_v37 = vpop.eup %842 }
 0x334   :  { %v406_v41 = vmul.f32 %v843_v37, %v323_v24  ;;  %605 = vmatpush.msrb.mxu1 %v806_v36  ;;  %v845_v47 = vpop.eup %844  ;;  %vm411_vm10 = vweird.f32 %v843_v37 }
 0x335   :  { %757 = vmatmul.msk.f32.gmra.mxu1 %vm257_vm2, %v359_v39  ;;  %v436_v51 = vmul.f32 %v845_v47, %v1107_v9  ;;  %vm412_vm12 = vmor %vm410_vm11, %vm411_vm10  ;;  %vm441_vm5 = vweird.f32 %v845_v47 }
 0x336   :  { %v407_v45 = vsub.f32 1.0, %v406_v41  ;;  %vm442_vm7 = vmor %vm440_vm6, %vm441_vm5 }
 0x337   :  { %v437_v58 = vsub.f32 1.0, %v436_v51 }
 0x338   :  { %v408_v49 = vmul.f32 %v843_v37, %v407_v45 }
 0x339   :  { %v438_v1 = vmul.f32 %v845_v47, %v437_v58 }
 0x33a   :  { %v409_v30 = vadd.f32 %v843_v37, %v408_v49 }
 0x33b   :  { %v439_v8 = vadd.f32 %v845_v47, %v438_v1 }
 0x33c   :  { %v413_v56 = vsel %vm412_vm12, %v843_v37, %v409_v30 }
 0x33d   :  { %764 = vmatmul.msk.f32.vlgmr.msrb.gmra.mxu1 %vm257_vm2, %v404_v40  ;;  %v418_v62 = vsel %vm415_vm14, %v417_v59, %v413_v56 }
 0x33e   :  { %v419_v4 = vmul.f32 %v1093_v55, %v418_v62  ;;  %v443_v55 = vsel %vm442_vm7, %v845_v47, %v439_v8 }
 0x33f   :  { %v448_v14 = vsel %vm445_vm8, %v447_v13, %v443_v55 }
 0x340   :  { %v449_v15 = vmul.f32 %v1089_v52, %v448_v14 }
 0x344   :  { %v809_v2 = vpop.permute.xlu1 %808 }
 0x345   :  { %v810_v7 = vunpack.i.l.bf16 %v809_v2  ;;  %765 = vmatmul.msk.f32.gmra.mxu1 %vm257_vm2, %v419_v4  ;;  %v811_v11 = vunpack.i.h.bf16 %v809_v2 }
 0x347   :  { %670 = vmatpush.msra.mxu3 %v810_v7 }
 0x349   :  { %671 = vmatpush.msra.mxu3 %v811_v11 }
 0x34a   :  { %768 = vmatmul.msk.f32.vlgmr.msra.gmra.mxu3 %vm257_vm2, %v434_v63 }
 0x352   :  { %769 = vmatmul.msk.f32.gmra.mxu3 %vm257_vm2, %v449_v15 }
 0x3a9   :  { %v543_v20 = vpop.f32.mrf.mxu3 }
 0x3aa   :  { %v479_v46 = vpop.f32.mrf.mxu1 }
 0x3ab   :  { %762 = vmatmul.msk.f32.vlgmr.msra.gmra.mxu0 %vm108_vm1, %v479_v46 }
 0x3b1   :  { %v546_v52 = vpop.f32.mrf.mxu3 }
 0x3b2   :  { %v482_v9 = vpop.f32.mrf.mxu1 }
 0x3b3   :  { %763 = vmatmul.msk.f32.gmra.mxu0 %vm108_vm1, %v482_v9 }
 0x3ba   :  { %v607_v19 = vpop.f32.mrf.mxu1 }
 0x3bb   :  { %766 = vmatmul.msk.f32.vlgmr.msra.gmra.mxu2 %vm108_vm1, %v607_v19 }
 0x3c2   :  { %v610_v21 = vpop.f32.mrf.mxu1 }
 0x3c3   :  { %767 = vmatmul.msk.f32.gmra.mxu2 %vm108_vm1, %v610_v21 }
 0x3cd   :  { %v673_v22 = vpop.f32.mrf.mxu3 }
 0x3ce   :  { %770 = vmatmul.msk.f32.vlgmr.msrb.gmra.mxu0 %vm108_vm1, %v673_v22 }
 0x3d5   :  { %v676_v23 = vpop.f32.mrf.mxu3 }
 0x3d6   :  { %771 = vmatmul.msk.f32.gmra.mxu0 %vm108_vm1, %v676_v23 }
 0x428   :  { %v572_v24 = vpop.f32.mrf.mxu0 }
 0x429   :  { %v573_v27 = vadd.f32 %v572_v24, %v543_v20 }
 0x430   :  { %v575_v25 = vpop.f32.mrf.mxu0 }
 0x431   :  { %v576_v34 = vadd.f32 %v575_v25, %v546_v52 }
 0x43e   :  { %v636_v26 = vpop.f32.mrf.mxu2 }
 0x43f   :  { %v642_v28 = vadd.f32 %v636_v26, %v573_v27 }
 0x446   :  { %v639_v33 = vpop.f32.mrf.mxu2 }
 0x447   :  { %v643_v35 = vadd.f32 %v639_v33, %v576_v34 }
 0x44b   :  { %v702_v31 = vpop.f32.mrf.mxu0 }
 0x44c   :  { %v708_v32 = vadd.f32 %v702_v31, %v642_v28 }
 0x44e   :  { %v714_v6 = vadd.f32 %v813_v29, %v708_v32 }
 0x450   :  { %716 = vst.msk [vmem:[#allocation7] sm:$0xff] %vm72_vm0, %v714_v6 }
 0x453   :  { %v705_v36 = vpop.f32.mrf.mxu0 }
 0x454   :  { %v709_v37 = vadd.f32 %v705_v36, %v643_v35 }
 0x456   :  { %v715_v38 = vadd.f32 %v813_v29, %v709_v37 }
 0x458   :  { %717 = vst.msk [vmem:[#allocation7 + $0x8] sm:$0xff] %vm72_vm0, %v715_v38 }
 0x459   :  { %730 = dma.vmem_to_hbm [thread:$0]  %s723_s28, 256, %s725_s2, [#allocation4], %s925_s29, %s925_s29, %s926_s30  }
 0x45a   :  { %922 = dma.done.wait [#allocation4], 256  }
 0x45b   :  { %923 = vsyncadd [#allocation4], 4294967040 }
 0x45c   :  { %735 = vsyncpa [#allocation3], 1 }
 0x45d   :  { %736 = vsyncpa [#allocation6], 1 }
 0x45e   :  { %737 = vsyncpa [#allocation4], 1 }

</bundles_post_ra>
